<compile_context>
chip_gen: v7x
topology: tpu7x:2x2x1
jax: 0.10.0
libtpu: 0.0.40
codegen_flags: <defaults>
</compile_context>

<pallas_src>
import math

import jax
import jax.numpy as jnp
import numpy as np
from jax.experimental import pallas as pl
from jax.experimental.pallas import tpu as pltpu

_LOG_2PI = math.log(2.0 * math.pi)

_VMEM_LIMIT = 32 * 1024 * 1024          # scoped-VMEM limit (safe on v5e/v6e/v7x)
_VMEM_BLOCK_BUDGET = 12 * 1024 * 1024   # budget for the double-buffered blocks
_MAX_TILE = 4096                        # hard cap on the sample-axis tile


def _round_up(n, m):
    return ((n + m - 1) // m) * m


# ----------------------------------------------------------------------------
# Fused Pallas kernel (natural (N, D) layout: samples on sublanes, D on lanes)
# ----------------------------------------------------------------------------
def _make_fused_kernel(n_lvl, level_consts):
    """Build the fused forward kernel.

    Per ladder level l (static unrolled loop, n_lvl is small):
        z_l        = x * qs_l + qb_l                     (approx-q affine flow)
        sampled_x  = z_l * p_scale + p_shift = x * a_l + b_l   (pretrained flow)
        logq_l     = 0.5*(||z_l||^2 - ||x||^2) + (logdet_p - logdet_q_l)
      with ||z_l||^2 = sum(u_l*x^2 + v_l*x) + sum(qb_l^2)  (last term folded
      into the per-level constant, baked in as a scalar immediate).
    Once per tile (level-invariant):
        logz       = N(0,I).logp(x) = -0.5*||x||^2 - 0.5*D*log(2*pi)
    """
    level_consts = tuple(float(c) for c in level_consts)

    def kernel(p_ref, x_ref, *out_refs):
        sx_refs = out_refs[:n_lvl]
        logq_ref = out_refs[n_lvl]
        logz_ref = out_refs[n_lvl + 1]

        x = x_ref[...]                                   # (T, D) f32
        d = x.shape[-1]
        x2 = x * x
        sq_x = jnp.sum(x2, axis=-1, keepdims=True)       # (T, 1) per-sample ||x||^2
        logz_ref[...] = -0.5 * sq_x - (0.5 * d) * _LOG_2PI

        p = p_ref[...]                                   # (4*n_lvl, D) packed params
        cols = []
        for l in range(n_lvl):                           # static unroll
            a = p[l:l + 1, :]                            # qs_l * p_scale
            b = p[n_lvl + l:n_lvl + l + 1, :]            # qb_l * p_scale + p_shift
            u = p[2 * n_lvl + l:2 * n_lvl + l + 1, :]    # qs_l ** 2
            v = p[3 * n_lvl + l:3 * n_lvl + l + 1, :]    # 2 * qs_l * qb_l
            # pretrained_affine(approx_q_affine_l(x)) collapsed to one affine:
            sx_refs[l][...] = (x * a + b).astype(sx_refs[l].dtype)
            sq_z = jnp.sum(x2 * u + x * v, axis=-1, keepdims=True)   # (T, 1)
            cols.append(0.5 * (sq_z - sq_x) + level_consts[l])
        logq_ref[...] = jnp.concatenate(cols, axis=-1)   # (T, n_lvl), one store

    return kernel


# ----------------------------------------------------------------------------
# Pallas wrapper
# ----------------------------------------------------------------------------
def fused_forward(x, params, level_consts, *, sx_dtype=None):
    """x: (N, D) samples (natural layout, no transposes anywhere).

    params      : (4*n_lvl, D) packed per-feature parameters [a; b; u; v]
    level_consts: length-n_lvl tuple of host floats (baked into the kernel)

    Returns:
      sampled_x_ls : list of n_lvl arrays of shape (N, D)
      logq         : (N, n_lvl)  (log q_l(x) - log p(z_l))
      logz         : (N,)        (base-dist log prob of x, level-invariant)
    """
    n, d = x.shape
    n_lvl = params.shape[0] // 4
    sx_dtype = x.dtype if sx_dtype is None else sx_dtype
    # On v5e, pass sx_dtype=jnp.bfloat16 to halve the dominant write traffic.

    # --- sample-axis tile derived from the VMEM budget -----------------------
    d_lanes = _round_up(d, 128)                           # VMEM lane padding
    bytes_per_sample = 4 * ((1 + n_lvl) * d_lanes + 2 * 128)   # x + sx + logq + logz
    tile = (_VMEM_BLOCK_BUDGET // (2 * bytes_per_sample)) // 8 * 8  # 2x double buffer
    tile = max(8, min(tile, _MAX_TILE))
    if n >= 256:
        # Keep >= 2 grid steps so the "parallel" axis can shard across both
        # TensorCores of a v7x megacore.
        tile = min(tile, _round_up((n + 1) // 2, 8))
    tile = min(tile, n)

    # Ragged last tile (if tile does not divide n) is handled by Pallas:
    # out-of-range reads only feed rows whose writes are dropped.
    grid = (pl.cdiv(n, tile),)

    out_shape = tuple(
        [jax.ShapeDtypeStruct((n, d), sx_dtype) for _ in range(n_lvl)]
        + [jax.ShapeDtypeStruct((n, n_lvl), jnp.float32),
           jax.ShapeDtypeStruct((n, 1), jnp.float32)])
    out_specs = tuple(
        [pl.BlockSpec((tile, d), lambda i: (i, 0)) for _ in range(n_lvl)]
        + [pl.BlockSpec((tile, n_lvl), lambda i: (i, 0)),
           pl.BlockSpec((tile, 1), lambda i: (i, 0))])

    outs = pl.pallas_call(
        _make_fused_kernel(n_lvl, level_consts),
        out_shape=out_shape,
        grid=grid,
        in_specs=[pl.BlockSpec((4 * n_lvl, d), lambda i: (0, 0)),   # packed params
                  pl.BlockSpec((tile, d), lambda i: (i, 0))],       # x tile
        out_specs=out_specs,
        compiler_params=pltpu.CompilerParams(
            dimension_semantics=("parallel",),
            vmem_limit_bytes=_VMEM_LIMIT),
    )(params, x)

    sampled_x_ls = list(outs[:n_lvl])
    logq = outs[n_lvl]
    logz = outs[n_lvl + 1][:, 0]
    return sampled_x_ls, logq, logz


# ----------------------------------------------------------------------------
# CanModel
# ----------------------------------------------------------------------------
class CanModel:
    def __init__(self, idx_ladder, data_shape, key, bound_q=None):
        self.idx_ladder = list(idx_ladder)
        self.data_shape = int(data_shape)
        self.bound_q = bound_q
        self.x = None
        d = self.data_shape
        n_lvl = len(self.idx_ladder)
        self.n_lvl = n_lvl

        # Deterministic synthetic affine-flow parameters standing in for the
        # external `model` (per-level approx-q flow) and `pretrained` flow.
        # Built with NumPy so the per-level log-det constants can be baked
        # into the kernel as scalar immediates.
        qs = np.stack([1.0 + 0.05 * l + 0.01 * np.arange(d, dtype=np.float32)
                       for l in range(n_lvl)], axis=0)              # (L, D)
        qb = np.stack([0.1 * (l + 1) * np.ones((d,), np.float32)
                       for l in range(n_lvl)], axis=0)               # (L, D)
        p_scale = (0.9 + 0.005 * np.arange(d, dtype=np.float32))     # (D,)
        p_shift = np.linspace(-0.5, 0.5, d, dtype=np.float32)        # (D,)

        # Packed per-feature parameter rows (one VMEM-resident tile):
        #   sampled_x_l = x * a_l + b_l
        #   ||z_l||^2   = sum(u_l*x^2 + v_l*x) + sum(qb_l^2)
        a = qs * p_scale
        b = qb * p_scale + p_shift
        u = qs * qs
        v = 2.0 * qs * qb
        self.params = jnp.asarray(
            np.concatenate([a, b, u, v], axis=0).astype(np.float32))  # (4L, D)

        # Per-level scalar constant (baked into the kernel):
        #   c_l = 0.5*sum(qb_l^2) + logdet_p - logdet_q_l
        logdet_q = np.sum(np.log(np.abs(qs)), axis=1)                 # (L,)
        logdet_p = float(np.sum(np.log(np.abs(p_scale))))
        self.level_consts = tuple(
            float(0.5 * np.sum(qb[l] ** 2) + logdet_p - logdet_q[l])
            for l in range(n_lvl))

        # Raw parameters kept for the pure-JAX reference check.
        self._qs, self._qb, self._ps, self._pb = qs, qb, p_scale, p_shift

        # self.zi = base_dist.sample(num_samples=1)
        self.zi = jax.random.normal(key, (1, d), dtype=jnp.float32)

    def forward(self, num_samples, key, sx_dtype=None):
        d = self.data_shape
        n_lvl = self.n_lvl

        # x = base_dist.sample(num_samples);  x[0] = self.zi
        # Sampled directly in the kernel's natural (N, D) layout.
        x = jax.random.normal(key, (num_samples, d), dtype=jnp.float32)
        x = x.at[0].set(self.zi[0])
        self.x = x

        # TODO(synk): `bound_q` is an external entropy-bound callable; only the
        # default (None) code path of the original module is implemented here.

        sampled_x_ls, logq, logz = fused_forward(
            x, self.params, self.level_consts, sx_dtype=sx_dtype)

        log_probq_ls = [logq[:, l] for l in range(n_lvl)]   # (N,) each (tiny slices)
        # All levels share the same base-dist log-prob array (level-invariant),
        # matching the reference semantics.
        log_probz_ls = [logz for _ in range(n_lvl)]
        return sampled_x_ls, log_probq_ls, log_probz_ls


# ----------------------------------------------------------------------------
# Pure-JAX reference (for correctness checks of the fused kernel)
# ----------------------------------------------------------------------------
def _reference_forward(x, qs, qb, p_scale, p_shift):
    n_lvl = qs.shape[0]

    def base_lp(v):
        return jnp.sum(-0.5 * v * v - 0.5 * _LOG_2PI, axis=-1)

    logdet_q = jnp.sum(jnp.log(jnp.abs(qs)), axis=-1)     # (L,)
    logdet_p = jnp.sum(jnp.log(jnp.abs(p_scale)))
    sx_ls, lq_ls, lz_ls = [], [], []
    for l in range(n_lvl):
        z = x * qs[l] + qb[l]
        logq = base_lp(x) - logdet_q[l]
        logp = base_lp(z) - logdet_p
        sx_ls.append(z * p_scale + p_shift)
        lq_ls.append(logq - logp)
        lz_ls.append(base_lp(x))
    return sx_ls, lq_ls, lz_ls


# ----------------------------------------------------------------------------
if __name__ == "__main__":
    key = jax.random.PRNGKey(0)
    k_init, k_fwd, k_fwd2 = jax.random.split(key, 3)

    DATA_SHAPE = 32
    IDX_LADDER = [2, 4]          # two ladder levels
    NUM_SAMPLES = 8

    model = CanModel(IDX_LADDER, DATA_SHAPE, k_init)

    # ---- small run (single tile) --------------------------------------------
    sampled_x_ls, log_probq_ls, log_probz_ls = model.forward(NUM_SAMPLES, k_fwd)
    for t in list(sampled_x_ls) + list(log_probq_ls) + list(log_probz_ls):
        jax.block_until_ready(t)

    x_ref = jax.random.normal(k_fwd, (NUM_SAMPLES, DATA_SHAPE), dtype=jnp.float32)
    x_ref = x_ref.at[0].set(model.zi[0])
    ref_sx, ref_lq, ref_lz = _reference_forward(
        x_ref, jnp.asarray(model._qs), jnp.asarray(model._qb),
        jnp.asarray(model._ps), jnp.asarray(model._pb))
    for a, b in zip(sampled_x_ls, ref_sx):
        np.testing.assert_allclose(np.asarray(a), np.asarray(b),
                                   rtol=1e-3, atol=1e-3)
    for a, b in zip(log_probq_ls, ref_lq):
        np.testing.assert_allclose(np.asarray(a), np.asarray(b),
                                   rtol=1e-3, atol=1e-3)
    for a, b in zip(log_probz_ls, ref_lz):
        np.testing.assert_allclose(np.asarray(a), np.asarray(b),
                                   rtol=1e-3, atol=1e-3)

    # ---- larger run: multi-tile grid + ragged last tile ---------------------
    N2 = 610
    s2, q2, z2 = model.forward(N2, k_fwd2)
    for t in list(s2) + list(q2) + list(z2):
        jax.block_until_ready(t)
    x2_ref = jax.random.normal(k_fwd2, (N2, DATA_SHAPE), dtype=jnp.float32)
    x2_ref = x2_ref.at[0].set(model.zi[0])
    r_sx, r_lq, r_lz = _reference_forward(
        x2_ref, jnp.asarray(model._qs), jnp.asarray(model._qb),
        jnp.asarray(model._ps), jnp.asarray(model._pb))
    for a, b in zip(s2, r_sx):
        np.testing.assert_allclose(np.asarray(a), np.asarray(b),
                                   rtol=1e-3, atol=1e-3)
    for a, b in zip(q2, r_lq):
        np.testing.assert_allclose(np.asarray(a), np.asarray(b),
                                   rtol=1e-3, atol=1e-3)
    for a, b in zip(z2, r_lz):
        np.testing.assert_allclose(np.asarray(a), np.asarray(b),
                                   rtol=1e-3, atol=1e-3)

    print("KERNEL_OK")
</pallas_src>

<mosaic_0001>
module attributes {stable_mosaic.version = 11 : i64} {
  func.func @kernel(%arg0: i32, %arg1: memref<8x32xf32, #tpu.memory_space<vmem>>, %arg2: memref<8x32xf32, #tpu.memory_space<vmem>>, %arg3: memref<8x32xf32, #tpu.memory_space<vmem>>, %arg4: memref<8x32xf32, #tpu.memory_space<vmem>>, %arg5: memref<8x2xf32, #tpu.memory_space<vmem>>, %arg6: memref<8x1xf32, #tpu.memory_space<vmem>>) attributes {dimension_semantics = [#tpu.dimension_semantics<parallel>], iteration_bounds = array<i64: 1>, scalar_prefetch = 0 : i64, scratch_operands = 0 : i64, tpu.core_type = #tpu.core_type<tc>, window_params = [{pipeline_mode = #tpu.pipeline_mode<synchronous>, transform_indices = @transform_0, window_bounds = array<i64: 8, 32>}, {transform_indices = @transform_1, window_bounds = array<i64: 8, 32>}, {transform_indices = @transform_2, window_bounds = array<i64: 8, 32>}, {transform_indices = @transform_3, window_bounds = array<i64: 8, 32>}, {transform_indices = @transform_4, window_bounds = array<i64: 8, 2>}, {transform_indices = @transform_5, window_bounds = array<i64: 8, 1>}]} {
    %c0 = arith.constant 0 : index
    %c0_0 = arith.constant 0 : index
    %0 = vector.load %arg2[%c0, %c0_0] : memref<8x32xf32, #tpu.memory_space<vmem>>, vector<8x32xf32>
    %1 = arith.mulf %0, %0 : vector<8x32xf32>
    %cst = arith.constant dense<0.000000e+00> : vector<8xf32>
    %2 = vector.multi_reduction <add>, %1, %cst [1] : vector<8x32xf32> to vector<8xf32>
    %3 = vector.shape_cast %2 : vector<8xf32> to vector<8x1xf32>
    %cst_1 = arith.constant -5.000000e-01 : f32
    %4 = vector.broadcast %cst_1 : f32 to vector<8x1xf32>
    %5 = arith.mulf %4, %3 : vector<8x1xf32>
    %cst_2 = arith.constant 29.4060326 : f32
    %6 = vector.broadcast %cst_2 : f32 to vector<8x1xf32>
    %7 = arith.subf %5, %6 : vector<8x1xf32>
    %c0_3 = arith.constant 0 : index
    %c0_4 = arith.constant 0 : index
    %8 = vector.load %arg6[%c0_3, %c0_4] : memref<8x1xf32, #tpu.memory_space<vmem>>, vector<8x1xf32>
    tpu.vector_store %arg6[%c0_3, %c0_4], %7 {strides = array<i32>} : memref<8x1xf32, #tpu.memory_space<vmem>>, vector<8x1xf32>,
    %c0_5 = arith.constant 0 : index
    %c0_6 = arith.constant 0 : index
    %9 = vector.load %arg1[%c0_5, %c0_6] : memref<8x32xf32, #tpu.memory_space<vmem>>, vector<8x32xf32>
    %10 = vector.extract_strided_slice %9 {offsets = [0, 0], sizes = [1, 32], strides = [1, 1]} : vector<8x32xf32> to vector<1x32xf32>
    %11 = vector.extract_strided_slice %9 {offsets = [2, 0], sizes = [1, 32], strides = [1, 1]} : vector<8x32xf32> to vector<1x32xf32>
    %12 = vector.extract_strided_slice %9 {offsets = [4, 0], sizes = [1, 32], strides = [1, 1]} : vector<8x32xf32> to vector<1x32xf32>
    %13 = vector.extract_strided_slice %9 {offsets = [6, 0], sizes = [1, 32], strides = [1, 1]} : vector<8x32xf32> to vector<1x32xf32>
    %14 = vector.broadcast %10 : vector<1x32xf32> to vector<8x32xf32>
    %15 = arith.mulf %0, %14 : vector<8x32xf32>
    %16 = vector.broadcast %11 : vector<1x32xf32> to vector<8x32xf32>
    %17 = arith.addf %15, %16 : vector<8x32xf32>
    %c0_7 = arith.constant 0 : index
    %c0_8 = arith.constant 0 : index
    %18 = vector.load %arg3[%c0_7, %c0_8] : memref<8x32xf32, #tpu.memory_space<vmem>>, vector<8x32xf32>
    tpu.vector_store %arg3[%c0_7, %c0_8], %17 {strides = array<i32>} : memref<8x32xf32, #tpu.memory_space<vmem>>, vector<8x32xf32>,
    %19 = vector.broadcast %12 : vector<1x32xf32> to vector<8x32xf32>
    %20 = arith.mulf %1, %19 : vector<8x32xf32>
    %21 = vector.broadcast %13 : vector<1x32xf32> to vector<8x32xf32>
    %22 = arith.mulf %0, %21 : vector<8x32xf32>
    %23 = arith.addf %20, %22 : vector<8x32xf32>
    %cst_9 = arith.constant dense<0.000000e+00> : vector<8xf32>
    %24 = vector.multi_reduction <add>, %23, %cst_9 [1] : vector<8x32xf32> to vector<8xf32>
    %25 = vector.shape_cast %24 : vector<8xf32> to vector<8x1xf32>
    %26 = arith.subf %25, %3 : vector<8x1xf32>
    %cst_10 = arith.constant 5.000000e-01 : f32
    %27 = vector.broadcast %cst_10 : f32 to vector<8x1xf32>
    %28 = arith.mulf %27, %26 : vector<8x1xf32>
    %cst_11 = arith.constant -5.11235523 : f32
    %29 = vector.broadcast %cst_11 : f32 to vector<8x1xf32>
    %30 = arith.addf %28, %29 : vector<8x1xf32>
    %31 = vector.extract_strided_slice %9 {offsets = [1, 0], sizes = [1, 32], strides = [1, 1]} : vector<8x32xf32> to vector<1x32xf32>
    %32 = vector.extract_strided_slice %9 {offsets = [3, 0], sizes = [1, 32], strides = [1, 1]} : vector<8x32xf32> to vector<1x32xf32>
    %33 = vector.extract_strided_slice %9 {offsets = [5, 0], sizes = [1, 32], strides = [1, 1]} : vector<8x32xf32> to vector<1x32xf32>
    %34 = vector.extract_strided_slice %9 {offsets = [7, 0], sizes = [1, 32], strides = [1, 1]} : vector<8x32xf32> to vector<1x32xf32>
    %35 = vector.broadcast %31 : vector<1x32xf32> to vector<8x32xf32>
    %36 = arith.mulf %0, %35 : vector<8x32xf32>
    %37 = vector.broadcast %32 : vector<1x32xf32> to vector<8x32xf32>
    %38 = arith.addf %36, %37 : vector<8x32xf32>
    %c0_12 = arith.constant 0 : index
    %c0_13 = arith.constant 0 : index
    %39 = vector.load %arg4[%c0_12, %c0_13] : memref<8x32xf32, #tpu.memory_space<vmem>>, vector<8x32xf32>
    tpu.vector_store %arg4[%c0_12, %c0_13], %38 {strides = array<i32>} : memref<8x32xf32, #tpu.memory_space<vmem>>, vector<8x32xf32>,
    %40 = vector.broadcast %33 : vector<1x32xf32> to vector<8x32xf32>
    %41 = arith.mulf %1, %40 : vector<8x32xf32>
    %42 = vector.broadcast %34 : vector<1x32xf32> to vector<8x32xf32>
    %43 = arith.mulf %0, %42 : vector<8x32xf32>
    %44 = arith.addf %41, %43 : vector<8x32xf32>
    %cst_14 = arith.constant dense<0.000000e+00> : vector<8xf32>
    %45 = vector.multi_reduction <add>, %44, %cst_14 [1] : vector<8x32xf32> to vector<8xf32>
    %46 = vector.shape_cast %45 : vector<8xf32> to vector<8x1xf32>
    %47 = arith.subf %46, %3 : vector<8x1xf32>
    %cst_15 = arith.constant 5.000000e-01 : f32
    %48 = vector.broadcast %cst_15 : f32 to vector<8x1xf32>
    %49 = arith.mulf %48, %47 : vector<8x1xf32>
    %cst_16 = arith.constant -5.99689054 : f32
    %50 = vector.broadcast %cst_16 : f32 to vector<8x1xf32>
    %51 = arith.addf %49, %50 : vector<8x1xf32>
    %52 = tpu.concatenate %30, %51 in 1 : vector<8x1xf32>, vector<8x1xf32> -> vector<8x2xf32>
    %c0_17 = arith.constant 0 : index
    %c0_18 = arith.constant 0 : index
    %53 = vector.load %arg5[%c0_17, %c0_18] : memref<8x2xf32, #tpu.memory_space<vmem>>, vector<8x2xf32>
    tpu.vector_store %arg5[%c0_17, %c0_18], %52 {strides = array<i32>} : memref<8x2xf32, #tpu.memory_space<vmem>>, vector<8x2xf32>,
    return
  }
  func.func @transform_0(%arg0: i32) -> (i32, i32) {
    %c0_i32 = arith.constant 0 : i32
    %c0_i32_0 = arith.constant 0 : i32
    %c0_i32_1 = arith.constant 0 : i32
    return %c0_i32, %c0_i32_0 : i32, i32
  }
  func.func @transform_1(%arg0: i32) -> (i32, i32) {
    %c0_i32 = arith.constant 0 : i32
    %c0_i32_0 = arith.constant 0 : i32
    return %arg0, %c0_i32 : i32, i32
  }
  func.func @transform_2(%arg0: i32) -> (i32, i32) {
    %c0_i32 = arith.constant 0 : i32
    %c0_i32_0 = arith.constant 0 : i32
    return %arg0, %c0_i32 : i32, i32
  }
  func.func @transform_3(%arg0: i32) -> (i32, i32) {
    %c0_i32 = arith.constant 0 : i32
    %c0_i32_0 = arith.constant 0 : i32
    return %arg0, %c0_i32 : i32, i32
  }
  func.func @transform_4(%arg0: i32) -> (i32, i32) {
    %c0_i32 = arith.constant 0 : i32
    %c0_i32_0 = arith.constant 0 : i32
    return %arg0, %c0_i32 : i32, i32
  }
  func.func @transform_5(%arg0: i32) -> (i32, i32) {
    %c0_i32 = arith.constant 0 : i32
    %c0_i32_0 = arith.constant 0 : i32
    return %arg0, %c0_i32 : i32, i32
  }
}

</mosaic_0001>

<bundles_post_ra>
// kernel: tpu_custom_call.1
= control target key start
LH: loop header
LB: loop body
LE: loop exit
PB: predicated region body
PF: predicated region fallthrough
CT: control target
= control target key end

     0   :  { %11 = vsyncpa [#allocation3], 0  ;;  %s343_s0 = inlined_call_operand.hbm [shape: f32[8,32], index: 0, kind: input, shape index: {}]   ;;  %s344_s1 = inlined_call_operand.hbm [shape: f32[8,32], index: 1, kind: input, shape index: {}]   ;;  %s345_s2 = inlined_call_operand.hbm [shape: f32[8,32], index: 2, kind: output, shape index: {0}]   ;;  %s346_s3 = inlined_call_operand.hbm [shape: f32[8,32], index: 3, kind: output, shape index: {1}]   ;;  %s347_s4 = inlined_call_operand.vmem [shape: f32[8,2], index: 4, kind: output, shape index: {2}]   ;;  %s348_s5 = inlined_call_operand.vmem [shape: f32[8,1], index: 5, kind: output, shape index: {3}]  }
   0x1   :  { %12 = vsyncpa [#allocation6], 0 }
   0x2   :  { %13 = vsyncpa [#allocation4], 0 }
   0x3   :  { %14 = vsyncpa [#allocation9], 0  ;;  %s250_s18 = smov [#allocation2]   ;;  %s251_s20 = smov [#allocation5]  }
   0x4   :  { %s21_s19 = sshll.u32 %s250_s18, 4  ;;  %s31_s21 = sshll.u32 %s251_s20, 4  ;;  %s22_s19 = int_to_ptr.vmem [resolvable:$true] %s21_s19  ;;  %s32_s21 = int_to_ptr.vmem [resolvable:$true] %s31_s21 }
   0x5   :  { %s154_s24 = scalar_lea.hbm %s343_s0, 128 }
   0x6   :  { %p155_p0 = scmp.ne.s32.totalorder %s343_s0, %s154_s24  ;;  %p158_p1 = scmp.lt.u32.totalorder %s154_s24, %s343_s0 }
   0x8   :  { %p160_p2 = pnand %p158_p1, %p155_p0 }
   0xa   :  { %163 = shalt.err (!%p160_p2)
}
   0xb   :  { %s164_s29 = scalar_lea.vmem %s22_s19, 128  ;;  %p169_p4 = scmp.lt.s32.totalorder %s22_s19, %s22_s19 }
   0xc   :  { %p165_p3 = scmp.ne.s32.totalorder %s22_s19, %s164_s29  ;;  %p170_p5 = scmp.lt.s32.totalorder %s164_s29, %s164_s29 }
   0xe   :  { %p171_p6 = por %p170_p5, %p169_p4 }
  0x10   :  { %p172_p7 = pnand %p171_p6, %p165_p3 }
  0x12   :  { %175 = shalt.err (!%p172_p7)
}
  0x13   :  { %24 = dma.hbm_to_vmem [thread:$0]  %s343_s0, 128, %s22_s19, [#allocation3]  }
  0x14   :  { %s176_s9 = scalar_lea.hbm %s344_s1, 128 }
  0x15   :  { %p177_p8 = scmp.ne.s32.totalorder %s344_s1, %s176_s9  ;;  %p180_p9 = scmp.lt.u32.totalorder %s176_s9, %s344_s1 }
  0x17   :  { %p182_p10 = pnand %p180_p9, %p177_p8 }
  0x19   :  { %185 = shalt.err (!%p182_p10)
}
  0x1a   :  { %s186_s14 = scalar_lea.vmem %s32_s21, 128  ;;  %p191_p12 = scmp.lt.s32.totalorder %s32_s21, %s32_s21 }
  0x1b   :  { %p187_p11 = scmp.ne.s32.totalorder %s32_s21, %s186_s14  ;;  %p192_p13 = scmp.lt.s32.totalorder %s186_s14, %s186_s14 }
  0x1d   :  { %p193_p0 = por %p192_p13, %p191_p12 }
  0x1f   :  { %p194_p1 = pnand %p193_p0, %p187_p11 }
  0x21   :  { %197 = shalt.err (!%p194_p1)
}
  0x22   :  { %34 = dma.hbm_to_vmem [thread:$0]  %s344_s1, 128, %s32_s21, [#allocation6]  }
  0x23   :  { %242 = dma.done.wait [#allocation3], 128  }
  0x24   :  { %243 = vsyncadd [#allocation3], 4294967168 }
  0x25   :  { %244 = dma.done.wait [#allocation6], 128  }
  0x26   :  { %245 = vsyncadd [#allocation6], 4294967168  ;;  %v52_v0 = vlaneseq  ;;  %v41_v6 = vld [vmem:[#allocation5] sm:$0xff]  ;;  %vm43_vm0 = vcmask 261120   ;;  %v51_v7 = vld [vmem:[#allocation2] sm:$0xff]  ;;  %s252_s1 = smov [#allocation7]  }
  0x27   :  { %v42_v8 = vmul.f32 %v41_v6, %v41_v6  ;;  %s117_s16 = sshll.u32 %s252_s1, 4  ;;  %s253_s17 = smov [#allocation8]   ;;  %s118_s16 = int_to_ptr.vmem [resolvable:$true] %s117_s16 }
  0x28   :  { %v53_v1 = vshrl.u32 %v52_v0, 7  ;;  %s127_s18 = sshll.u32 %s253_s17, 4  ;;  %s198_s19 = scalar_lea.vmem %s118_s16, 128  ;;  %s128_s18 = int_to_ptr.vmem [resolvable:$true] %s127_s18 }
  0x29   :  { %v44_v13 = vsel %vm43_vm0, %v42_v8, 0.0  ;;  %p199_p2 = scmp.ne.s32.totalorder %s118_s16, %s198_s19  ;;  %p203_p3 = scmp.lt.s32.totalorder %s118_s16, %s118_s16 }
  0x2a   :  { %v93_v2 = vsub.s32 5, %v53_v1  ;;  %v98_v3 = vsub.s32 7, %v53_v1  ;;  %v65_v4 = vsub.s32 4, %v53_v1  ;;  %v70_v5 = vsub.s32 6, %v53_v1  ;;  %45 = vadd.xlane.f32.xlu0 %v44_v13  ;;  %p204_p4 = scmp.lt.s32.totalorder %s198_s19, %s198_s19 }
  0x2b   :  { %v54_v22 = vsub.s32 0, %v53_v1  ;;  %v82_v23 = vsub.s32 1, %v53_v1  ;;  %v59_v25 = vsub.s32 2, %v53_v1  ;;  %v87_v27 = vsub.s32 3, %v53_v1 }
  0x2c   :  { %v94_v9 = vrot.slane %v51_v7, %v93_v2  ;;  %v99_v10 = vrot.slane %v51_v7, %v98_v3  ;;  %v66_v11 = vrot.slane %v51_v7, %v65_v4  ;;  %v71_v12 = vrot.slane %v51_v7, %v70_v5  ;;  %p205_p5 = por %p204_p4, %p203_p3 }
  0x2d   :  { %v55_v24 = vrot.slane %v51_v7, %v54_v22  ;;  %v83_v26 = vrot.slane %v51_v7, %v82_v23  ;;  %v60_v29 = vrot.slane %v51_v7, %v59_v25  ;;  %v88_v31 = vrot.slane %v51_v7, %v87_v27 }
  0x2e   :  { %v95_v14 = vmul.f32 %v94_v9, %v42_v8  ;;  %v100_v15 = vmul.f32 %v99_v10, %v41_v6  ;;  %v67_v16 = vmul.f32 %v66_v11, %v42_v8  ;;  %v72_v17 = vmul.f32 %v71_v12, %v41_v6  ;;  %p206_p6 = pnand %p205_p5, %p199_p2 }
  0x2f   :  { %v56_v28 = vmul.f32 %v55_v24, %v41_v6  ;;  %v84_v30 = vmul.f32 %v83_v26, %v41_v6 }
  0x30   :  { %v101_v18 = vadd.f32 %v100_v15, %v95_v14  ;;  %v73_v19 = vadd.f32 %v72_v17, %v67_v16 }
  0x31   :  { %v61_v32 = vadd.f32 %v60_v29, %v56_v28  ;;  %v89_v33 = vadd.f32 %v88_v31, %v84_v30 }
  0x32   :  { %v102_v20 = vsel %vm43_vm0, %v101_v18, 0.0  ;;  %v74_v21 = vsel %vm43_vm0, %v73_v19, 0.0 }
  0x33   :  { %103 = vadd.xlane.f32.xlu1 %v102_v20  ;;  %75 = vadd.xlane.f32.xlu0 %v74_v21  ;;  %62 = vst.msk [vmem:[#allocation7] sm:$0xff] %vm43_vm0, %v61_v32  ;;  %90 = vst.msk [vmem:[#allocation8] sm:$0xff] %vm43_vm0, %v89_v33 }
  0x34   :  { %209 = shalt.err (!%p206_p6)
}
  0x35   :  { %s210_s22 = scalar_lea.hbm %s345_s2, 128 }
  0x36   :  { %p211_p7 = scmp.ne.s32.totalorder %s345_s2, %s210_s22  ;;  %p214_p8 = scmp.lt.u32.totalorder %s210_s22, %s345_s2 }
  0x38   :  { %p216_p9 = pnand %p214_p8, %p211_p7 }
  0x3a   :  { %219 = shalt.err (!%p216_p9)
}
  0x3b   :  { %120 = dma.vmem_to_hbm [thread:$0]  %s118_s16, 128, %s345_s2, [#allocation4]  }
  0x3c   :  { %s220_s29 = scalar_lea.vmem %s128_s18, 128  ;;  %p225_p11 = scmp.lt.s32.totalorder %s128_s18, %s128_s18 }
  0x3d   :  { %p221_p10 = scmp.ne.s32.totalorder %s128_s18, %s220_s29  ;;  %p226_p12 = scmp.lt.s32.totalorder %s220_s29, %s220_s29 }
  0x3f   :  { %p227_p13 = por %p226_p12, %p225_p11 }
  0x41   :  { %p228_p0 = pnand %p227_p13, %p221_p10 }
  0x43   :  { %231 = shalt.err (!%p228_p0)
}
  0x44   :  { %s232_s7 = scalar_lea.hbm %s346_s3, 128 }
  0x45   :  { %p233_p1 = scmp.ne.s32.totalorder %s346_s3, %s232_s7  ;;  %p236_p2 = scmp.lt.u32.totalorder %s232_s7, %s346_s3 }
  0x47   :  { %p238_p3 = pnand %p236_p2, %p233_p1 }
  0x49   :  { %241 = shalt.err (!%p238_p3)
}
  0x4a   :  { %130 = dma.vmem_to_hbm [thread:$0]  %s128_s18, 128, %s346_s3, [#allocation9]   ;;  %vm49_vm1 = vcmask 7168   ;;  %vm109_vm2 = vcmask 15360  }
  0xb7   :  { %v46_v34 = vpop.xlane.xlu0 %45 }
  0xb8   :  { %v47_v35 = vmul.f32 -0.5, %v46_v34 }
  0xba   :  { %v149_v36 = vadd.f32 -29.406033, %v47_v35 }
  0xbc   :  { %50 = vst.msk [vmem:[%s348_s5] sm:$0xff] %vm49_vm1, %v149_v36 }
  0xc0   :  { %v104_v37 = vpop.xlane.xlu1 %103  ;;  %v76_v39 = vpop.xlane.xlu0 %75 }
  0xc1   :  { %v105_v38 = vsub.f32 %v104_v37, %v46_v34  ;;  %v77_v40 = vsub.f32 %v76_v39, %v46_v34 }
  0xc3   :  { %v106_v41 = vmul.f32 0.5, %v105_v38  ;;  %v78_v42 = vmul.f32 0.5, %v77_v40 }
  0xc5   :  { %v107_v43 = vadd.f32 -5.9968905, %v106_v41  ;;  %v79_v44 = vadd.f32 -5.112355, %v78_v42 }
  0xc7   :  { %v108_v45 = vsel %vm49_vm1, %v79_v44, %v107_v43 }
  0xc8   :  { %110 = vst.msk [vmem:[%s347_s4] sm:$0xff] %vm109_vm2, %v108_v45 }
  0xc9   :  { %246 = dma.done.wait [#allocation4], 128  }
  0xca   :  { %247 = vsyncadd [#allocation4], 4294967168 }
  0xcb   :  { %248 = dma.done.wait [#allocation9], 128  }
  0xcc   :  { %249 = vsyncadd [#allocation9], 4294967168 }
  0xcd   :  { %145 = vsyncpa [#allocation3], 1 }
  0xce   :  { %146 = vsyncpa [#allocation6], 1 }
  0xcf   :  { %147 = vsyncpa [#allocation4], 1 }
  0xd0   :  { %148 = vsyncpa [#allocation9], 1 }

</bundles_post_ra>
